<compile_context>
chip_gen: v5e
topology: v5e:2x2
jax: 0.10.0
libtpu: 0.0.40
codegen_flags: <defaults>
</compile_context>

<pallas_src>
import functools

import jax
import jax.numpy as jnp
from jax import lax
from jax.experimental import pallas as pl
from jax.experimental.pallas import tpu as pltpu

LANE = 128


def _round_up(x, m):
    return (x + m - 1) // m * m


def _fused_actor_critic_kernel(xt_ref, w1t_ref, b1_ref, w2t_ref, b2_ref,
                               out_ref, *, n_actions):
    # Layer 1 (critic-hidden and actor-hidden stacked on sublanes) + ReLU.
    # bf16 x bf16 -> f32 accumulation on the MXU; bias add in f32.
    h1 = jnp.dot(w1t_ref[...], xt_ref[...],
                 preferred_element_type=jnp.float32) + b1_ref[...]
    h1 = jnp.maximum(h1, 0.0)

    # Layer 2: slim block-diagonal head. Row 0 = value, rows 1..1+A = actor
    # logits, remaining rows are exact zeros (zero-padded W2^T / b2).
    h2 = jnp.dot(w2t_ref[...], h1.astype(w2t_ref.dtype),
                 preferred_element_type=jnp.float32) + b2_ref[...]

    # Numerically-stable softmax over the logit rows (sublane axis, <=8 rows).
    row = lax.broadcasted_iota(jnp.int32, h2.shape, 0)
    is_logit = jnp.logical_and(row >= 1, row < 1 + n_actions)
    masked = jnp.where(is_logit, h2, jnp.float32(-1e30))
    m = jnp.max(masked, axis=0, keepdims=True)
    e = jnp.exp(masked - m)                       # non-logit rows underflow to 0
    denom = jnp.sum(e, axis=0, keepdims=True)
    r = pl.reciprocal(denom, approx=True)         # EUP slot (free next to exp)
    r = r * (2.0 - denom * r)                     # one Newton step -> f32 accuracy
    probs = e * r

    # Slim lane-dense slab: value on row 0, probs on rows 1..1+A, zeros after.
    out_ref[...] = jnp.where(row == 0, h2, probs)


def actor_critic_forward(x, packed, *, target_tile=2048):
    """Fused ActorCritic forward. Returns (probs, value) like the PyTorch module
    (probs parameterizes the Categorical distribution)."""
    B = x.shape[0]
    h2_dim, input_dim = packed["w1t"].shape        # [2H, input_dim]
    out_rows = packed["w2t"].shape[0]
    n_actions = packed["n_actions"]
    compute_dtype = packed["w1t"].dtype

    # --- batch tiling (batch lives on the lane axis) --------------------------
    b_pad0 = _round_up(max(B, 1), LANE)
    n_blocks = b_pad0 // LANE
    # >=2 grid steps whenever the batch allows it, so the "parallel" axis can
    # shard across v7x's two TensorCores; cap each step at `target_tile` lanes.
    grid_n = max(pl.cdiv(b_pad0, target_tile), min(2, n_blocks))
    tile_b = pl.cdiv(n_blocks, grid_n) * LANE      # multiple of 128 lanes
    grid_n = pl.cdiv(b_pad0, tile_b)
    b_pad = grid_n * tile_b                        # pad waste < grid_n * 128 rows

    # Batch-on-lanes layout: x^T in the MXU compute dtype, batch padded to b_pad.
    xt = jnp.pad(x.astype(compute_dtype).T, ((0, 0), (0, b_pad - B)))

    kernel = functools.partial(_fused_actor_critic_kernel, n_actions=n_actions)

    slab = pl.pallas_call(
        kernel,
        out_shape=jax.ShapeDtypeStruct((out_rows, b_pad), jnp.float32),
        grid=(grid_n,),
        in_specs=[
            pl.BlockSpec((input_dim, tile_b), lambda i: (0, i)),   # x^T tile
            pl.BlockSpec((h2_dim, input_dim), lambda i: (0, 0)),   # fused W1^T
            pl.BlockSpec((h2_dim, 1), lambda i: (0, 0)),           # fused b1
            pl.BlockSpec((out_rows, h2_dim), lambda i: (0, 0)),    # slim W2^T
            pl.BlockSpec((out_rows, 1), lambda i: (0, 0)),         # slim b2
        ],
        out_specs=pl.BlockSpec((out_rows, tile_b), lambda i: (0, i)),
        compiler_params=pltpu.CompilerParams(
            dimension_semantics=("parallel",),     # v7x: both TensorCores
        ),
    )(xt, packed["w1t"], packed["b1"], packed["w2t"], packed["b2"])

    value = slab[0:1, :B].T                        # [B, 1]
    probs = slab[1:1 + n_actions, :B].T            # [B, A]
    return probs, value


def init_raw_params(key, input_dim, output_dim, hidden_dim):
    """PyTorch-Linear-like uniform init for the four unfused layers."""
    ks = jax.random.split(key, 8)

    def lin(kw, kb, fan_in, fan_out):
        bound = 1.0 / jnp.sqrt(jnp.float32(fan_in))
        w = jax.random.uniform(kw, (fan_in, fan_out), jnp.float32, -bound, bound)
        b = jax.random.uniform(kb, (1, fan_out), jnp.float32, -bound, bound)
        return w, b

    wc1, bc1 = lin(ks[0], ks[1], input_dim, hidden_dim)
    wc2, bc2 = lin(ks[2], ks[3], hidden_dim, 1)
    wa1, ba1 = lin(ks[4], ks[5], input_dim, hidden_dim)
    wa2, ba2 = lin(ks[6], ks[7], hidden_dim, output_dim)
    return dict(wc1=wc1, bc1=bc1, wc2=wc2, bc2=bc2,
                wa1=wa1, ba1=ba1, wa2=wa2, ba2=ba2)


def pack_params(raw, compute_dtype=jnp.bfloat16):
    """One-time packing of the two branches into a fused, transposed, slim form."""
    input_dim, hidden = raw["wc1"].shape
    n_actions = raw["wa2"].shape[1]
    out_rows = _round_up(1 + n_actions, 8)         # value row + actor rows, rnd8

    # First layer, fused and transposed: [2H, input_dim], bias [2H, 1].
    w1t = jnp.concatenate([raw["wc1"], raw["wa1"]], axis=1).T
    b1 = jnp.concatenate([raw["bc1"], raw["ba1"]], axis=1).T

    # Second layer, slim block-diagonal, transposed: [out_rows, 2H].
    #   row 0        <- critic head (reads critic hidden, cols 0..H)
    #   rows 1..1+A  <- actor head  (reads actor hidden, cols H..2H)
    w2t = jnp.zeros((out_rows, 2 * hidden), jnp.float32)
    w2t = w2t.at[0:1, :hidden].set(raw["wc2"].T)
    w2t = w2t.at[1:1 + n_actions, hidden:].set(raw["wa2"].T)
    b2 = jnp.zeros((out_rows, 1), jnp.float32)
    b2 = b2.at[0, 0].set(raw["bc2"][0, 0])
    b2 = b2.at[1:1 + n_actions, 0].set(raw["ba2"][0])

    return dict(w1t=w1t.astype(compute_dtype),
                b1=b1.astype(jnp.float32),
                w2t=w2t.astype(compute_dtype),
                b2=b2.astype(jnp.float32),
                n_actions=n_actions)


if __name__ == "__main__":
    key = jax.random.PRNGKey(0)
    k_x, k_x2, k_p = jax.random.split(key, 3)

    batch, input_dim, output_dim, hidden_dim = 8, 16, 4, 32
    x = jax.random.normal(k_x, (batch, input_dim), dtype=jnp.float32)

    raw = init_raw_params(k_p, input_dim, output_dim, hidden_dim)
    packed = pack_params(raw)

    # Reference: the original (unfused, f32) two-branch math.
    def ref(x, p):
        hc = jnp.maximum(x @ p["wc1"] + p["bc1"], 0.0)
        v = hc @ p["wc2"] + p["bc2"]
        ha = jnp.maximum(x @ p["wa1"] + p["ba1"], 0.0)
        logits = ha @ p["wa2"] + p["ba2"]
        return jax.nn.softmax(logits, axis=1), v

    # Case 1: small batch (single grid step).
    probs, value = actor_critic_forward(x, packed)
    jax.block_until_ready((probs, value))
    probs_ref, value_ref = ref(x, raw)
    assert probs.shape == (batch, output_dim) and value.shape == (batch, 1)
    # bf16 MXU operands with f32 accumulation -> compare at bf16-level tolerance.
    assert jnp.allclose(probs, probs_ref, atol=2e-2, rtol=2e-2)
    assert jnp.allclose(value, value_ref, atol=2e-2, rtol=2e-2)
    assert jnp.allclose(jnp.sum(probs, axis=1), 1.0, atol=1e-5)

    # Case 2: ragged batch exercising the multi-step "parallel" grid + padding.
    batch2 = 260
    x2 = jax.random.normal(k_x2, (batch2, input_dim), dtype=jnp.float32)
    probs2, value2 = actor_critic_forward(x2, packed)
    jax.block_until_ready((probs2, value2))
    probs2_ref, value2_ref = ref(x2, raw)
    assert probs2.shape == (batch2, output_dim) and value2.shape == (batch2, 1)
    assert jnp.allclose(probs2, probs2_ref, atol=2e-2, rtol=2e-2)
    assert jnp.allclose(value2, value2_ref, atol=2e-2, rtol=2e-2)
    assert jnp.allclose(jnp.sum(probs2, axis=1), 1.0, atol=1e-5)

    print("KERNEL_OK")
</pallas_src>

<mosaic_0001>
module attributes {stable_mosaic.version = 11 : i64} {
  func.func @_fused_actor_critic_kernel(%arg0: i32, %arg1: memref<16x128xbf16, #tpu.memory_space<vmem>>, %arg2: memref<64x16xbf16, #tpu.memory_space<vmem>>, %arg3: memref<64x1xf32, #tpu.memory_space<vmem>>, %arg4: memref<8x64xbf16, #tpu.memory_space<vmem>>, %arg5: memref<8x1xf32, #tpu.memory_space<vmem>>, %arg6: memref<8x128xf32, #tpu.memory_space<vmem>>) attributes {dimension_semantics = [#tpu.dimension_semantics<parallel>], iteration_bounds = array<i64: 1>, scalar_prefetch = 0 : i64, scratch_operands = 0 : i64, tpu.core_type = #tpu.core_type<tc>, window_params = [{transform_indices = @transform_0, window_bounds = array<i64: 16, 128>}, {pipeline_mode = #tpu.pipeline_mode<synchronous>, transform_indices = @transform_1, window_bounds = array<i64: 64, 16>}, {pipeline_mode = #tpu.pipeline_mode<synchronous>, transform_indices = @transform_2, window_bounds = array<i64: 64, 1>}, {pipeline_mode = #tpu.pipeline_mode<synchronous>, transform_indices = @transform_3, window_bounds = array<i64: 8, 64>}, {pipeline_mode = #tpu.pipeline_mode<synchronous>, transform_indices = @transform_4, window_bounds = array<i64: 8, 1>}, {transform_indices = @transform_5, window_bounds = array<i64: 8, 128>}]} {
    %c0 = arith.constant 0 : index
    %c0_0 = arith.constant 0 : index
    %0 = vector.load %arg2[%c0, %c0_0] : memref<64x16xbf16, #tpu.memory_space<vmem>>, vector<64x16xbf16>
    %c0_1 = arith.constant 0 : index
    %c0_2 = arith.constant 0 : index
    %1 = vector.load %arg1[%c0_1, %c0_2] : memref<16x128xbf16, #tpu.memory_space<vmem>>, vector<16x128xbf16>
    %cst = arith.constant dense<0.000000e+00> : vector<64x128xf32>
    %2 = tpu.matmul %0, %1, %cst {dimension_numbers = #tpu.dot_dimension_numbers<[1], [0], [0], [1], [0, 0, 1, 1], [], []>} : vector<64x16xbf16>, vector<16x128xbf16>, vector<64x128xf32> -> vector<64x128xf32>
    %c0_3 = arith.constant 0 : index
    %c0_4 = arith.constant 0 : index
    %3 = vector.load %arg3[%c0_3, %c0_4] : memref<64x1xf32, #tpu.memory_space<vmem>>, vector<64x1xf32>
    %4 = vector.broadcast %3 : vector<64x1xf32> to vector<64x128xf32>
    %5 = arith.addf %2, %4 : vector<64x128xf32>
    %cst_5 = arith.constant 0.000000e+00 : f32
    %6 = vector.broadcast %cst_5 : f32 to vector<64x128xf32>
    %7 = arith.maximumf %5, %6 : vector<64x128xf32>
    %c0_6 = arith.constant 0 : index
    %c0_7 = arith.constant 0 : index
    %8 = vector.load %arg4[%c0_6, %c0_7] : memref<8x64xbf16, #tpu.memory_space<vmem>>, vector<8x64xbf16>
    %9 = arith.truncf %7 : vector<64x128xf32> to vector<64x128xbf16>
    %cst_8 = arith.constant dense<0.000000e+00> : vector<8x128xf32>
    %10 = tpu.matmul %8, %9, %cst_8 {dimension_numbers = #tpu.dot_dimension_numbers<[1], [0], [0], [1], [0, 0, 1, 1], [], []>} : vector<8x64xbf16>, vector<64x128xbf16>, vector<8x128xf32> -> vector<8x128xf32>
    %c0_9 = arith.constant 0 : index
    %c0_10 = arith.constant 0 : index
    %11 = vector.load %arg5[%c0_9, %c0_10] : memref<8x1xf32, #tpu.memory_space<vmem>>, vector<8x1xf32>
    %12 = vector.broadcast %11 : vector<8x1xf32> to vector<8x128xf32>
    %13 = arith.addf %10, %12 : vector<8x128xf32>
    %14 = tpu.iota {dimensions = array<i32: 0>} : vector<8x128xi32>
    %c1_i32 = arith.constant 1 : i32
    %15 = vector.broadcast %c1_i32 : i32 to vector<8x128xi32>
    %16 = arith.cmpi sge, %14, %15 : vector<8x128xi32>
    %c5_i32 = arith.constant 5 : i32
    %17 = vector.broadcast %c5_i32 : i32 to vector<8x128xi32>
    %18 = arith.cmpi slt, %14, %17 : vector<8x128xi32>
    %19 = arith.andi %16, %18 : vector<8x128xi1>
    %cst_11 = arith.constant -1.000000e+30 : f32
    %20 = vector.broadcast %cst_11 : f32 to vector<8x128xf32>
    %21 = arith.select %19, %13, %20 : vector<8x128xi1>, vector<8x128xf32>
    %cst_12 = arith.constant dense<0xFF800000> : vector<128xf32>
    %22 = vector.multi_reduction <maximumf>, %21, %cst_12 [0] : vector<8x128xf32> to vector<128xf32>
    %23 = vector.shape_cast %22 : vector<128xf32> to vector<1x128xf32>
    %24 = vector.broadcast %23 : vector<1x128xf32> to vector<8x128xf32>
    %25 = arith.subf %21, %24 : vector<8x128xf32>
    %26 = math.exp %25 : vector<8x128xf32>
    %cst_13 = arith.constant dense<0.000000e+00> : vector<128xf32>
    %27 = vector.multi_reduction <add>, %26, %cst_13 [0] : vector<8x128xf32> to vector<128xf32>
    %28 = vector.shape_cast %27 : vector<128xf32> to vector<1x128xf32>
    %29 = tpu.reciprocal %28 {approx = true} : vector<1x128xf32> -> vector<1x128xf32>
    %30 = arith.mulf %28, %29 : vector<1x128xf32>
    %cst_14 = arith.constant 2.000000e+00 : f32
    %31 = vector.broadcast %cst_14 : f32 to vector<1x128xf32>
    %32 = arith.subf %31, %30 : vector<1x128xf32>
    %33 = arith.mulf %29, %32 : vector<1x128xf32>
    %34 = vector.broadcast %33 : vector<1x128xf32> to vector<8x128xf32>
    %35 = arith.mulf %26, %34 : vector<8x128xf32>
    %c0_i32 = arith.constant 0 : i32
    %36 = vector.broadcast %c0_i32 : i32 to vector<8x128xi32>
    %37 = arith.cmpi eq, %14, %36 : vector<8x128xi32>
    %38 = arith.select %37, %13, %35 : vector<8x128xi1>, vector<8x128xf32>
    %c0_15 = arith.constant 0 : index
    %c0_16 = arith.constant 0 : index
    %39 = vector.load %arg6[%c0_15, %c0_16] : memref<8x128xf32, #tpu.memory_space<vmem>>, vector<8x128xf32>
    tpu.vector_store %arg6[%c0_15, %c0_16], %38 {strides = array<i32>} : memref<8x128xf32, #tpu.memory_space<vmem>>, vector<8x128xf32>,
    return
  }
  func.func @transform_0(%arg0: i32) -> (i32, i32) {
    %c0_i32 = arith.constant 0 : i32
    %c0_i32_0 = arith.constant 0 : i32
    return %c0_i32, %arg0 : i32, i32
  }
  func.func @transform_1(%arg0: i32) -> (i32, i32) {
    %c0_i32 = arith.constant 0 : i32
    %c0_i32_0 = arith.constant 0 : i32
    %c0_i32_1 = arith.constant 0 : i32
    return %c0_i32, %c0_i32_0 : i32, i32
  }
  func.func @transform_2(%arg0: i32) -> (i32, i32) {
    %c0_i32 = arith.constant 0 : i32
    %c0_i32_0 = arith.constant 0 : i32
    %c0_i32_1 = arith.constant 0 : i32
    return %c0_i32, %c0_i32_0 : i32, i32
  }
  func.func @transform_3(%arg0: i32) -> (i32, i32) {
    %c0_i32 = arith.constant 0 : i32
    %c0_i32_0 = arith.constant 0 : i32
    %c0_i32_1 = arith.constant 0 : i32
    return %c0_i32, %c0_i32_0 : i32, i32
  }
  func.func @transform_4(%arg0: i32) -> (i32, i32) {
    %c0_i32 = arith.constant 0 : i32
    %c0_i32_0 = arith.constant 0 : i32
    %c0_i32_1 = arith.constant 0 : i32
    return %c0_i32, %c0_i32_0 : i32, i32
  }
  func.func @transform_5(%arg0: i32) -> (i32, i32) {
    %c0_i32 = arith.constant 0 : i32
    %c0_i32_0 = arith.constant 0 : i32
    return %c0_i32, %arg0 : i32, i32
  }
}

</mosaic_0001>

<bundles_post_ra>
// kernel: tpu_custom_call.1
= control target key start
LH: loop header
LB: loop body
LE: loop exit
PB: predicated region body
PF: predicated region fallthrough
CT: control target
= control target key end

     0   :  { %v296_v3 = vmov 0   ;;  %vm106_vm0 = vcmask 130048   ;;  %s380_s0 = inlined_call_operand.vmem [shape: bf16[16,128], index: 0, kind: input, shape index: {}]   ;;  %s381_s1 = inlined_call_operand.vmem [shape: bf16[64,16], index: 1, kind: input, shape index: {}]   ;;  %s382_s2 = inlined_call_operand.vmem [shape: f32[64,1], index: 2, kind: input, shape index: {}]   ;;  %s383_s3 = inlined_call_operand.vmem [shape: bf16[8,64], index: 3, kind: input, shape index: {}]   ;;  %s384_s4 = inlined_call_operand.vmem [shape: f32[8,1], index: 4, kind: input, shape index: {}]   ;;  %s385_s5 = inlined_call_operand.hbm [shape: f32[8,128], index: 5, kind: output, shape index: {}]  }
   0x1   :  { %v258_v0 = vld [vmem:[%s380_s0] sm:$0xff]  ;;  %v255_v1 = vld [vmem:[%s381_s1 + $0x8] sm:$0xff]  ;;  %v257_v2 = vld [vmem:[%s381_s1 + $0x18] sm:$0xff]  ;;  %264 = vset.pattern.permute.xlu1 %v296_v3  ;;  %263 = vset.pattern.permute.xlu0 %v296_v3 }
   0x2   :  { %v38_v4 = vld [vmem:[%s382_s2 + $0x30] sm:$0xff]  ;;  %v36_v5 = vld [vmem:[%s382_s2 + $0x20] sm:$0xff]  ;;  %259 = vmatpush.bf16.msra.mxu2 %v258_v0  ;;  %260 = vmatpush.bf16.msra.mxu3 %v258_v0 }
   0x3   :  { %v254_v6 = vld [vmem:[%s381_s1] sm:$0xff]  ;;  %126 = vmatpush.bf16.msra.mxu0 %v258_v0  ;;  %72 = vperm.xlu0 %263, %v38_v4   ;;  %v34_v7 = vld [vmem:[%s382_s2 + $0x10] sm:$0xff] }
   0x4   :  { %62 = vperm.xlu1 %264, %v36_v5   ;;  %265 = vset.pattern.permute.xlu2 %v296_v3 }
   0x5   :  { %10 = vsyncpa [#allocation3], 0  ;;  %250 = vmatmul.msk.bf16.vlgmr.msra.gmra.mxu2 %vm106_vm0, %v255_v1  ;;  %252 = vmatmul.msk.bf16.vlgmr.msra.gmra.mxu3 %vm106_vm0, %v257_v2  ;;  %v39_v8 = vld [vmem:[%s382_s2 + $0x38] sm:$0xff]  ;;  %v37_v9 = vld [vmem:[%s382_s2 + $0x28] sm:$0xff]  ;;  %vm167_vm1 = vcmask 523264   ;;  %v184_v52 = vlaneseq  ;;  %s220_s22 = sshll.u32 %s385_s5, 4  ;;  %s221_s22 = int_to_ptr.hbm [resolvable:$true] %s220_s22 }
   0x6   :  { %249 = vmatmul.msk.bf16.vlgmr.msra.gmra.mxu0 %vm106_vm0, %v254_v6  ;;  %52 = vperm.xlu2 %265, %v34_v7   ;;  %v35_v10 = vld [vmem:[%s382_s2 + $0x18] sm:$0xff]  ;;  %v32_v11 = vld [vmem:[%s382_s2] sm:$0xff]  ;;  %v256_v12 = vld [vmem:[%s381_s1 + $0x10] sm:$0xff] }
   0x7   :  { %v33_v13 = vld [vmem:[%s382_s2 + $0x8] sm:$0xff]  ;;  %v161_v14 = vld [vmem:[%s384_s4] sm:$0xff]  ;;  %v185_v53 = vshrl.u32 %v184_v52, 7 }
   0x8   :  { %v156_v51 = vld [vmem:[%s383_s3] sm:$0xf]  ;;  %s297_s3 = smov [#allocation2]  }
   0x9   :  { %vm186_vm2 = vcmp.ge.s32.totalorder %v185_v53, 1  ;;  %vm187_vm3 = vcmp.lt.s32.totalorder %v185_v53, 5  ;;  %s218_s4 = sshll.u32 %s297_s3, 4  ;;  %vm210_vm5 = vcmp.eq.s32.totalorder %v185_v53, 0  ;;  %s219_s4 = int_to_ptr.vmem [resolvable:$true] %s218_s4 }
   0xa   :  { %vm188_vm4 = vmand %vm186_vm2, %vm187_vm3 }
   0xb   :  { %77 = vperm.xlu0 %263, %v39_v8  }
   0xc   :  { %67 = vperm.xlu1 %264, %v37_v9  }
   0xe   :  { %57 = vperm.xlu2 %265, %v35_v10  }
  0x13   :  { %42 = vperm.xlu0 %263, %v32_v11  }
  0x14   :  { %47 = vperm.xlu1 %264, %v33_v13  }
  0x15   :  { %251 = vmatmul.msk.bf16.gmra.mxu2 %vm106_vm0, %v256_v12 }
  0x16   :  { %164 = vperm.xlu2 %265, %v161_v14  }
  0x60   :  { %v53_v26 = vpop.permute.xlu2 %52 }
  0x68   :  { %v58_v31 = vpop.permute.xlu2 %57 }
  0x70   :  { %v165_v54 = vpop.permute.xlu2 %164 }
  0x75   :  { %v73_v15 = vpop.permute.xlu0 %72 }
  0x76   :  { %v63_v18 = vpop.permute.xlu1 %62 }
  0x7d   :  { %v78_v20 = vpop.permute.xlu0 %77 }
  0x7e   :  { %v68_v28 = vpop.permute.xlu1 %67 }
  0x83   :  { %v128_v29 = vpop.f32.mrf.mxu0 }
  0x85   :  { %v43_v35 = vpop.permute.xlu0 %42 }
  0x86   :  { %v48_v37 = vpop.permute.xlu1 %47  ;;  %v129_v43 = vadd.f32 %v128_v29, %v43_v35 }
  0x88   :  { %v133_v16 = vpop.f32.mrf.mxu2  ;;  %v143_v17 = vpop.f32.mrf.mxu3  ;;  %v148_v47 = vmax.f32 %v129_v43, 0.0 }
  0x89   :  { %v144_v19 = vadd.f32 %v143_v17, %v73_v15  ;;  %v134_v39 = vadd.f32 %v133_v16, %v53_v26 }
  0x8b   :  { %v154_v23 = vmax.f32 %v144_v19, 0.0  ;;  %v130_v38 = vpop.f32.mrf.mxu0  ;;  %v150_v46 = vmax.f32 %v134_v39, 0.0 }
  0x8c   :  { %v131_v44 = vadd.f32 %v130_v38, %v48_v37 }
  0x8e   :  { %v149_v48 = vmax.f32 %v131_v44, 0.0 }
  0x90   :  { %v135_v21 = vpop.f32.mrf.mxu2  ;;  %v145_v22 = vpop.f32.mrf.mxu3  ;;  %v157_v50 = vpack.c.bf16 %v149_v48, %v148_v47 }
  0x91   :  { %v146_v24 = vadd.f32 %v145_v22, %v78_v20  ;;  %v136_v34 = vadd.f32 %v135_v21, %v58_v31 }
  0x93   :  { %v155_v25 = vmax.f32 %v146_v24, 0.0  ;;  %v151_v42 = vmax.f32 %v136_v34, 0.0 }
  0x95   :  { %v160_v27 = vpack.c.bf16 %v155_v25, %v154_v23  ;;  %v158_v49 = vpack.c.bf16 %v151_v42, %v150_v46 }
  0x97   :  { %175 = vmatpush.bf16.msra.mxu1 %v160_v27 }
  0x98   :  { %v138_v30 = vpop.f32.mrf.mxu2 }
  0x99   :  { %v139_v32 = vadd.f32 %v138_v30, %v63_v18 }
  0x9b   :  { %v152_v40 = vmax.f32 %v139_v32, 0.0 }
  0xa0   :  { %v140_v33 = vpop.f32.mrf.mxu2 }
  0xa1   :  { %v141_v36 = vadd.f32 %v140_v33, %v68_v28 }
  0xa3   :  { %v153_v41 = vmax.f32 %v141_v36, 0.0 }
  0xa5   :  { %v159_v45 = vpack.c.bf16 %v153_v41, %v152_v40 }
  0xa7   :  { %176 = vmatpush.bf16.msra.mxu1 %v159_v45 }
  0xab   :  { %177 = vmatpush.bf16.msra.mxu1 %v158_v49 }
  0xaf   :  { %178 = vmatpush.bf16.msra.mxu1 %v157_v50 }
  0xb2   :  { %253 = vmatmul.msk.bf16.vlgmr.msra.gmra.mxu1 %vm167_vm1, %v156_v51 }
 0x12f   :  { %v180_v55 = vpop.f32.mrf.mxu1 }
 0x130   :  { %v181_v56 = vadd.f32 %v180_v55, %v165_v54 }
 0x132   :  { %v189_v57 = vsel %vm188_vm4, %v181_v56, -1e+30 }
 0x133   :  { %v190_v58 = vrot.slane %v189_v57, 4 }
 0x135   :  { %v191_v59 = vmax.f32 %v189_v57, %v190_v58 }
 0x137   :  { %v192_v60 = vrot.slane %v191_v59, 2  ;;  %v182_v61 = vpop.f32.mrf.mxu1 }
 0x139   :  { %v193_v62 = vmax.f32 %v191_v59, %v192_v60 }
 0x13b   :  { %v194_v63 = vrot.slane %v193_v62, 1 }
 0x13d   :  { %v195_v0 = vmax.f32 %v193_v62, %v194_v63 }
 0x13f   :  { %v196_v1 = vsub.f32 %v189_v57, %v195_v0 }
 0x141   :  { %v197_v2 = vmul.f32 1.442695, %v196_v1 }
 0x143   :  { %266 = vpow2.f32 %v197_v2 }
 0x149   :  { %v267_v3 = vpop.eup %266 }
 0x14a   :  { %v199_v4 = vrot.slane %v267_v3, 4 }
 0x14c   :  { %v200_v5 = vadd.f32 %v267_v3, %v199_v4 }
 0x14e   :  { %v201_v6 = vrot.slane %v200_v5, 2 }
 0x150   :  { %v202_v7 = vadd.f32 %v201_v6, %v200_v5 }
 0x152   :  { %v203_v8 = vrot.slane %v202_v7, 1 }
 0x154   :  { %v204_v9 = vadd.f32 %v203_v8, %v202_v7 }
 0x156   :  { %268 = vrcp.f32 %v204_v9 }
 0x15c   :  { %v269_v10 = vpop.eup %268 }
 0x15d   :  { %v206_v11 = vmul.f32 %v269_v10, %v204_v9 }
 0x15f   :  { %v207_v12 = vsub.f32 2.0, %v206_v11 }
 0x161   :  { %v208_v13 = vmul.f32 %v269_v10, %v207_v12 }
 0x163   :  { %v209_v14 = vmul.f32 %v267_v3, %v208_v13 }
 0x165   :  { %v211_v15 = vsel %vm210_vm5, %v181_v56, %v209_v14 }
 0x166   :  { %212 = vst [vmem:[#allocation2] sm:$0xff] %v211_v15 }
 0x167   :  { %223 = dma.vmem_to_hbm [thread:$0]  %s219_s4, 128, %s221_s22, [#allocation3]  }
 0x168   :  { %294 = dma.done.wait [#allocation3], 128  }
 0x169   :  { %295 = vsyncadd [#allocation3], 4294967168 }
 0x16a   :  { %228 = vsyncpa [#allocation3], 1 }

</bundles_post_ra>
